<compile_context>
chip_gen: v7x
topology: tpu7x:2x2x1
jax: 0.10.0
libtpu: 0.0.40
codegen_flags: <defaults>
</compile_context>

<pallas_src>
import math

import jax
import jax.numpy as jnp
from jax.experimental import pallas as pl
from jax.experimental.pallas import tpu as pltpu


def channel_mixing_kernel(x_ref, wT_ref, bias_ref, o_ref):
    # x_ref:    (block_m, W)   packed rows (W = p*C, lane-dense)
    # wT_ref:   (W, W)         block-diagonal effective weight, already transposed
    # bias_ref: (1, W)         bias tiled p times
    # o_ref:    (block_m, W)
    y = jnp.dot(x_ref[...], wT_ref[...], preferred_element_type=jnp.float32)
    o_ref[...] = (y + bias_ref[...]).astype(o_ref.dtype)


def _round_up(v, m):
    return ((v + m - 1) // m) * m


def _pick_pack(C):
    """Pack p consecutive rows into one lane-dense row of width p*C (multiple of 128)."""
    if C % 128 == 0:
        return 1
    p = 128 // math.gcd(C, 128)
    if p * C <= 1024:
        return p
    return 1


def channel_mixing(x, adapt_input, params, *, block_rows=512):
    """x: (..., C) float32, adapt_input: (adapt_dim,) float32."""
    C = params["weight"].shape[0]

    orig_shape = x.shape
    xf = x.reshape(-1, C)
    M = xf.shape[0]

    # ---- Hoisted (grid-invariant) adaptive-weight computation: one tiny GEMV ----
    adapt_flat = params["adapt_w"] @ adapt_input + params["adapt_b"]       # (C*C,)
    weight = params["weight"] + adapt_flat.reshape(C, C)                   # (C_out, C_in)
    wT = jnp.transpose(weight)                                             # (C_in, C_out)

    # ---- Lane-dense row packing: p rows -> one row of width p*C ----
    p = _pick_pack(C)
    Mpad = _round_up(max(M, 1), p)
    if Mpad != M:
        xf = jnp.pad(xf, ((0, Mpad - M), (0, 0)))                          # zero-pad rows
    W = p * C
    Mp = Mpad // p
    xp = xf.reshape(Mp, W)                                                 # free reshape
    if p > 1:
        wT_big = jnp.kron(jnp.eye(p, dtype=wT.dtype), wT)                  # (W, W) block-diag
        bias_big = jnp.tile(params["bias"], p).reshape(1, W)               # (1, W)
    else:
        wT_big = wT
        bias_big = params["bias"].reshape(1, W)

    # ---- Tiling ----
    bm = min(_round_up(Mp, 8), block_rows)                                 # multiple of 8
    grid = (pl.cdiv(Mp, bm),)

    cost = pl.CostEstimate(
        flops=2 * Mp * W * W,
        transcendentals=0,
        bytes_accessed=(Mp * W * 4) * 2 + W * W * 4 + W * 4,
    )

    out = pl.pallas_call(
        channel_mixing_kernel,
        out_shape=jax.ShapeDtypeStruct((Mp, W), x.dtype),
        grid_spec=pltpu.PrefetchScalarGridSpec(
            num_scalar_prefetch=0,
            grid=grid,
            in_specs=[
                pl.BlockSpec((bm, W), lambda i: (i, 0)),
                pl.BlockSpec((W, W), lambda i: (0, 0)),
                pl.BlockSpec((1, W), lambda i: (0, 0)),
            ],
            out_specs=pl.BlockSpec((bm, W), lambda i: (i, 0)),
        ),
        compiler_params=pltpu.CompilerParams(
            dimension_semantics=("parallel",),
            vmem_limit_bytes=64 * 1024 * 1024,
        ),
        cost_estimate=cost,
    )(xp, wT_big, bias_big)

    out = out.reshape(Mpad, C)
    if Mpad != M:
        out = out[:M]
    return out.reshape(orig_shape)


def ref_forward(x, adapt_input, params):
    """Pure-JAX reference matching the PyTorch module exactly."""
    C = params["weight"].shape[0]
    adapt_w_mat = (params["adapt_w"] @ adapt_input + params["adapt_b"]).reshape(C, C)
    weight = params["weight"] + adapt_w_mat
    return x @ weight.T + params["bias"]


def init_params(key, channel_dim, adapt_dim):
    k1, k2, k3, k4 = jax.random.split(key, 4)
    return {
        # AdaptiveLinear.weight ~ randn(out, in)
        "weight": jax.random.normal(k1, (channel_dim, channel_dim), jnp.float32),
        # AdaptiveLinear.bias ~ randn(out)
        "bias": jax.random.normal(k2, (channel_dim,), jnp.float32),
        # nn.Linear(adapt_dim, out*in): weight (out*in, adapt_dim), bias (out*in,)
        "adapt_w": jax.random.normal(
            k3, (channel_dim * channel_dim, adapt_dim), jnp.float32) * 0.1,
        "adapt_b": jax.random.normal(
            k4, (channel_dim * channel_dim,), jnp.float32) * 0.1,
    }


if __name__ == "__main__":
    B, S, C, A = 2, 8, 32, 16   # batch, seq, channel_dim, adapt_dim

    key = jax.random.PRNGKey(0)
    kx, ka, kp = jax.random.split(key, 3)
    x = jax.random.normal(kx, (B, S, C), jnp.float32)
    adapt_input = jax.random.normal(ka, (A,), jnp.float32)
    params = init_params(kp, C, A)

    out = channel_mixing(x, adapt_input, params)
    out = jax.block_until_ready(out)

    expected = ref_forward(x, adapt_input, params)
    assert out.shape == (B, S, C)
    assert jnp.allclose(out, expected, atol=1e-4, rtol=1e-4), "mismatch vs reference"

    print("KERNEL_OK")
</pallas_src>

<mosaic_0001>
module attributes {stable_mosaic.version = 11 : i64} {
  func.func @channel_mixing_kernel(%arg0: i32, %arg1: memref<8x128xf32, #tpu.memory_space<vmem>>, %arg2: memref<128x128xf32, #tpu.memory_space<vmem>>, %arg3: memref<1x128xf32, #tpu.memory_space<vmem>>, %arg4: memref<8x128xf32, #tpu.memory_space<vmem>>) attributes {dimension_semantics = [#tpu.dimension_semantics<parallel>], iteration_bounds = array<i64: 1>, scalar_prefetch = 0 : i64, scratch_operands = 0 : i64, tpu.core_type = #tpu.core_type<tc>, window_params = [{transform_indices = @transform_0, window_bounds = array<i64: 8, 128>}, {pipeline_mode = #tpu.pipeline_mode<synchronous>, transform_indices = @transform_1, window_bounds = array<i64: 128, 128>}, {pipeline_mode = #tpu.pipeline_mode<synchronous>, transform_indices = @transform_2, window_bounds = array<i64: 1, 128>}, {transform_indices = @transform_3, window_bounds = array<i64: 8, 128>}]} {
    %c0 = arith.constant 0 : index
    %c0_0 = arith.constant 0 : index
    %0 = vector.load %arg1[%c0, %c0_0] : memref<8x128xf32, #tpu.memory_space<vmem>>, vector<8x128xf32>
    %c0_1 = arith.constant 0 : index
    %c0_2 = arith.constant 0 : index
    %1 = vector.load %arg2[%c0_1, %c0_2] : memref<128x128xf32, #tpu.memory_space<vmem>>, vector<128x128xf32>
    %cst = arith.constant dense<0.000000e+00> : vector<8x128xf32>
    %2 = tpu.matmul %0, %1, %cst {dimension_numbers = #tpu.dot_dimension_numbers<[1], [0], [0], [1], [0, 0, 1, 1], [], []>} : vector<8x128xf32>, vector<128x128xf32>, vector<8x128xf32> -> vector<8x128xf32>
    %c0_3 = arith.constant 0 : index
    %c0_4 = arith.constant 0 : index
    %3 = vector.load %arg3[%c0_3, %c0_4] : memref<1x128xf32, #tpu.memory_space<vmem>>, vector<1x128xf32>
    %4 = vector.broadcast %3 : vector<1x128xf32> to vector<8x128xf32>
    %5 = arith.addf %2, %4 : vector<8x128xf32>
    %c0_5 = arith.constant 0 : index
    %c0_6 = arith.constant 0 : index
    %6 = vector.load %arg4[%c0_5, %c0_6] : memref<8x128xf32, #tpu.memory_space<vmem>>, vector<8x128xf32>
    tpu.vector_store %arg4[%c0_5, %c0_6], %5 {strides = array<i32>} : memref<8x128xf32, #tpu.memory_space<vmem>>, vector<8x128xf32>,
    return
  }
  func.func @transform_0(%arg0: i32) -> (i32, i32) {
    %c0_i32 = arith.constant 0 : i32
    %c0_i32_0 = arith.constant 0 : i32
    return %arg0, %c0_i32 : i32, i32
  }
  func.func @transform_1(%arg0: i32) -> (i32, i32) {
    %c0_i32 = arith.constant 0 : i32
    %c0_i32_0 = arith.constant 0 : i32
    %c0_i32_1 = arith.constant 0 : i32
    return %c0_i32, %c0_i32_0 : i32, i32
  }
  func.func @transform_2(%arg0: i32) -> (i32, i32) {
    %c0_i32 = arith.constant 0 : i32
    %c0_i32_0 = arith.constant 0 : i32
    %c0_i32_1 = arith.constant 0 : i32
    return %c0_i32, %c0_i32_0 : i32, i32
  }
  func.func @transform_3(%arg0: i32) -> (i32, i32) {
    %c0_i32 = arith.constant 0 : i32
    %c0_i32_0 = arith.constant 0 : i32
    return %arg0, %c0_i32 : i32, i32
  }
}

</mosaic_0001>

<bundles_post_ra>
// kernel: tpu_custom_call.1
= control target key start
LH: loop header
LB: loop body
LE: loop exit
PB: predicated region body
PF: predicated region fallthrough
CT: control target
= control target key end

     0   :  { %8 = vsyncpa [#allocation3], 0  ;;  %s434_s0 = inlined_call_operand.hbm [shape: f32[4,128], index: 0, kind: input, shape index: {}]   ;;  %s435_s1 = inlined_call_operand.hbm [shape: f32[128,128], index: 1, kind: input, shape index: {}]   ;;  %s436_s2 = inlined_call_operand.hbm [shape: f32[1,128], index: 2, kind: input, shape index: {}]   ;;  %s437_s3 = inlined_call_operand.hbm [shape: f32[4,128], index: 3, kind: output, shape index: {}]  }
   0x1   :  { %9 = vsyncpa [#allocation6], 0 }
   0x2   :  { %10 = vsyncpa [#allocation4], 0 }
   0x3   :  { %15 = vsyncadd [#allocation3], 64  ;;  %s349_s12 = smov [#allocation5]   ;;  %s255_s16 = scalar_lea.hbm %s435_s1, 2048 }
   0x4   :  { %s28_s13 = sshll.u32 %s349_s12, 4  ;;  %p256_p0 = scmp.ne.s32.totalorder %s435_s1, %s255_s16  ;;  %s29_s13 = int_to_ptr.vmem [resolvable:$true] %s28_s13 }
   0x5   :  { %p259_p1 = scmp.lt.u32.totalorder %s255_s16, %s435_s1 }
   0x7   :  { %p261_p2 = pnand %p259_p1, %p256_p0 }
   0x9   :  { %264 = shalt.err (!%p261_p2)
}
   0xa   :  { %s265_s21 = scalar_lea.vmem %s29_s13, 2048  ;;  %p270_p4 = scmp.lt.s32.totalorder %s29_s13, %s29_s13 }
   0xb   :  { %p266_p3 = scmp.ne.s32.totalorder %s29_s13, %s265_s21  ;;  %p271_p5 = scmp.lt.s32.totalorder %s265_s21, %s265_s21 }
   0xd   :  { %p272_p6 = por %p271_p5, %p270_p4 }
   0xf   :  { %p273_p7 = pnand %p272_p6, %p266_p3 }
  0x11   :  { %276 = shalt.err (!%p273_p7)
}
  0x12   :  { %s350_s22 = smov 128   ;;  %s351_s23 = smov 8  }
  0x13   :  { %34 = dma.hbm_to_vmem [thread:$0]  %s435_s1, 2048, %s29_s13, [#allocation6], %s350_s22, %s350_s22, %s351_s23  }
  0x14   :  { %s352_s26 = smov [#allocation2]   ;;  %s277_s30 = scalar_lea.hbm %s434_s0, 64 }
  0x15   :  { %s16_s27 = sshll.u32 %s352_s26, 4  ;;  %p278_p8 = scmp.ne.s32.totalorder %s434_s0, %s277_s30  ;;  %s17_s27 = int_to_ptr.vmem [resolvable:$true] %s16_s27 }
  0x16   :  { %p281_p9 = scmp.lt.u32.totalorder %s277_s30, %s434_s0 }
  0x18   :  { %p283_p10 = pnand %p281_p9, %p278_p8 }
  0x1a   :  { %286 = shalt.err (!%p283_p10)
}
  0x1b   :  { %s287_s8 = scalar_lea.vmem %s17_s27, 64  ;;  %s291_s1 = scalar_lea.vmem %s17_s27, 128 }
  0x1c   :  { %p288_p11 = scmp.ne.s32.totalorder %s17_s27, %s287_s8  ;;  %p292_p12 = scmp.lt.s32.totalorder %s17_s27, %s17_s27 }
  0x1d   :  { %p293_p13 = scmp.lt.s32.totalorder %s291_s1, %s287_s8 }
  0x1f   :  { %p294_p0 = por %p293_p13, %p292_p12 }
  0x21   :  { %p295_p1 = pnand %p294_p0, %p288_p11 }
  0x23   :  { %298 = shalt.err (!%p295_p1)
}
  0x24   :  { %s353_s9 = smov 64   ;;  %s354_s10 = smov 4  }
  0x25   :  { %22 = dma.hbm_to_vmem [thread:$0]  %s434_s0, 64, %s17_s27, [#allocation3], %s353_s9, %s353_s9, %s354_s10  }
  0x26   :  { %s355_s13 = smov [#allocation7]   ;;  %s299_s17 = scalar_lea.hbm %s436_s2, 16 }
  0x27   :  { %s41_s14 = sshll.u32 %s355_s13, 4  ;;  %p300_p2 = scmp.ne.s32.totalorder %s436_s2, %s299_s17  ;;  %s42_s14 = int_to_ptr.vmem [resolvable:$true] %s41_s14 }
  0x28   :  { %p303_p3 = scmp.lt.u32.totalorder %s299_s17, %s436_s2 }
  0x2a   :  { %p305_p4 = pnand %p303_p3, %p300_p2 }
  0x2c   :  { %308 = shalt.err (!%p305_p4)
}
  0x2d   :  { %s309_s22 = scalar_lea.vmem %s42_s14, 16  ;;  %s313_s0 = scalar_lea.vmem %s42_s14, 32 }
  0x2e   :  { %p310_p5 = scmp.ne.s32.totalorder %s42_s14, %s309_s22  ;;  %p314_p6 = scmp.lt.s32.totalorder %s42_s14, %s42_s14 }
  0x2f   :  { %p315_p7 = scmp.lt.s32.totalorder %s313_s0, %s309_s22 }
  0x31   :  { %p316_p8 = por %p315_p7, %p314_p6 }
  0x33   :  { %p317_p9 = pnand %p316_p8, %p310_p5 }
  0x35   :  { %320 = shalt.err (!%p317_p9)
}
  0x36   :  { %44 = dma.hbm_to_vmem [thread:$0]  %s436_s2, 16, %s42_s14, [#allocation6]  }
  0x37   :  { %343 = dma.done.wait [#allocation3], 128  }
  0x38   :  { %344 = vsyncadd [#allocation3], 4294967168 }
  0x39   :  { %345 = dma.done.wait [#allocation6], 2064  }
  0x3a   :  { %346 = vsyncadd [#allocation6], 4294965232  ;;  %v356_v0 = vmov 0.0|0.0   ;;  %vm357_vm0 = vmmov 0   ;;  %v358_v1 = vmov 0.0   ;;  %v55_v2 = vld [vmem:[#allocation5] sm:$0xff] }
  0x3b   :  { %220 = vmatprep.subr.bf16.mxu0 %v356_v0  ;;  %217 = vmatprep.mubr.msk.f32.mxu0 %vm357_vm0, %v358_v1  ;;  %v56_v3 = vld [vmem:[#allocation5 + $0x8] sm:$0xff]  ;;  %v57_v4 = vld [vmem:[#allocation5 + $0x10] sm:$0xff]  ;;  %v58_v6 = vld [vmem:[#allocation5 + $0x18] sm:$0xff] }
  0x3c   :  { %v221_v5 = vpack.c.bf16 %v56_v3, %v55_v2  ;;  %v224_v7 = vpack.c.bf16 %v58_v6, %v57_v4  ;;  %v59_v8 = vld [vmem:[#allocation5 + $0x20] sm:$0xff]  ;;  %v60_v9 = vld [vmem:[#allocation5 + $0x28] sm:$0xff]  ;;  %v61_v11 = vld [vmem:[#allocation5 + $0x30] sm:$0xff] }
  0x3d   :  { %v227_v10 = vpack.c.bf16 %v60_v9, %v59_v8  ;;  %v62_v12 = vld [vmem:[#allocation5 + $0x38] sm:$0xff]  ;;  %v63_v14 = vld [vmem:[#allocation5 + $0x40] sm:$0xff]  ;;  %v64_v15 = vld [vmem:[#allocation5 + $0x48] sm:$0xff] }
  0x3e   :  { %222 = vmatpush3.bf16.msra.mxu0 %v221_v5  ;;  %v230_v13 = vpack.c.bf16 %v62_v12, %v61_v11  ;;  %v233_v16 = vpack.c.bf16 %v64_v15, %v63_v14  ;;  %v65_v17 = vld [vmem:[#allocation5 + $0x50] sm:$0xff]  ;;  %v66_v18 = vld [vmem:[#allocation5 + $0x58] sm:$0xff]  ;;  %v67_v20 = vld [vmem:[#allocation5 + $0x60] sm:$0xff] }
  0x3f   :  { %223 = vmatprep.subr.bf16.mxu0 %v356_v0  ;;  %v236_v19 = vpack.c.bf16 %v66_v18, %v65_v17  ;;  %v68_v21 = vld [vmem:[#allocation5 + $0x68] sm:$0xff]  ;;  %v69_v23 = vld [vmem:[#allocation5 + $0x70] sm:$0xff]  ;;  %v70_v24 = vld [vmem:[#allocation5 + $0x78] sm:$0xff] }
  0x40   :  { %v239_v22 = vpack.c.bf16 %v68_v21, %v67_v20  ;;  %v242_v25 = vpack.c.bf16 %v70_v24, %v69_v23  ;;  %v54_v26 = vld [vmem:[#allocation2] sm:$0xff]  ;;  %v167_v27 = vld [vmem:[#allocation7] ss:$0 sm:$0xff] }
  0x42   :  { %225 = vmatpush3.bf16.msra.mxu0 %v224_v7 }
  0x43   :  { %226 = vmatprep.subr.bf16.mxu0 %v356_v0 }
  0x46   :  { %228 = vmatpush3.bf16.msra.mxu0 %v227_v10 }
  0x47   :  { %229 = vmatprep.subr.bf16.mxu0 %v356_v0 }
  0x4a   :  { %231 = vmatpush3.bf16.msra.mxu0 %v230_v13 }
  0x4b   :  { %232 = vmatprep.subr.bf16.mxu0 %v356_v0 }
  0x4e   :  { %234 = vmatpush3.bf16.msra.mxu0 %v233_v16 }
  0x4f   :  { %235 = vmatprep.subr.bf16.mxu0 %v356_v0 }
  0x52   :  { %237 = vmatpush3.bf16.msra.mxu0 %v236_v19 }
  0x53   :  { %238 = vmatprep.subr.bf16.mxu0 %v356_v0 }
  0x56   :  { %240 = vmatpush3.bf16.msra.mxu0 %v239_v22 }
  0x57   :  { %241 = vmatprep.subr.bf16.mxu0 %v356_v0 }
  0x5a   :  { %243 = vmatpush3.bf16.msra.mxu0 %v242_v25 }
  0x5d   :  { %218 = vmatmul.mubr.f32.vlgmr.msra.gmra.mrb[0].mxu0 %v54_v26 }
 0x130   :  { %v144_v28 = vpop.f32.mrb[0].mxu0 }
 0x131   :  { %v145_v29 = vadd.f32 %v167_v27, %v144_v28  ;;  %v219_v30 = vpop.f32.mrb[1].mxu0 }
 0x133   :  { %148 = vst [vmem:[#allocation8] sm:$0xff] %v145_v29 }
 0x134   :  { %153 = vsyncadd [#allocation4], 64  ;;  %s359_s2 = smov [#allocation8]  }
 0x135   :  { %s154_s25 = sshll.u32 %s359_s2, 4  ;;  %s155_s25 = int_to_ptr.vmem [resolvable:$true] %s154_s25 }
 0x136   :  { %s321_s26 = scalar_lea.vmem %s155_s25, 64  ;;  %s325_s27 = scalar_lea.vmem %s155_s25, 128 }
 0x137   :  { %p322_p10 = scmp.ne.s32.totalorder %s155_s25, %s321_s26  ;;  %p326_p11 = scmp.lt.s32.totalorder %s155_s25, %s155_s25 }
 0x138   :  { %p327_p12 = scmp.lt.s32.totalorder %s325_s27, %s321_s26 }
 0x13a   :  { %p328_p13 = por %p327_p12, %p326_p11 }
 0x13c   :  { %p329_p0 = pnand %p328_p13, %p322_p10 }
 0x13e   :  { %332 = shalt.err (!%p329_p0)
}
 0x13f   :  { %s333_s30 = scalar_lea.hbm %s437_s3, 64 }
 0x140   :  { %p334_p1 = scmp.ne.s32.totalorder %s437_s3, %s333_s30  ;;  %p337_p2 = scmp.lt.u32.totalorder %s333_s30, %s437_s3 }
 0x142   :  { %p339_p3 = pnand %p337_p2, %p334_p1 }
 0x144   :  { %342 = shalt.err (!%p339_p3)
}
 0x145   :  { %160 = dma.vmem_to_hbm [thread:$0]  %s155_s25, 64, %s437_s3, [#allocation4], %s353_s9, %s353_s9, %s354_s10  }
 0x146   :  { %347 = dma.done.wait [#allocation4], 128  }
 0x147   :  { %348 = vsyncadd [#allocation4], 4294967168 }
 0x148   :  { %164 = vsyncpa [#allocation3], 1 }
 0x149   :  { %165 = vsyncpa [#allocation6], 1 }
 0x14a   :  { %166 = vsyncpa [#allocation4], 1 }

</bundles_post_ra>
